<compile_context>
chip_gen: v7x
topology: tpu7x:2x2x1
jax: 0.10.0
libtpu: 0.0.40
codegen_flags: <defaults>
</compile_context>

<pallas_src>
import functools

import jax
import jax.numpy as jnp
from jax.experimental import pallas as pl
from jax.experimental.pallas import tpu as pltpu


def _round_up(x, m):
    return (x + m - 1) // m * m


def _proj_kernel(x_ref, w_ref, b_ref, o_ref):
    # x_ref: (TM, K)   w_ref: (K, Ep)   b_ref: (1, Ep) f32   o_ref: (TM, Ep) f32
    # Single MXU pass (K and Ep are small); f32 accumulation; f32 bias add at store.
    acc = jnp.dot(x_ref[...], w_ref[...], preferred_element_type=jnp.float32)
    o_ref[...] = (acc + b_ref[...]).astype(o_ref.dtype)


def _num_row_blocks(M, K, E_pad, in_bytes, out_bytes,
                    vmem_budget_bytes=16 * 1024 * 1024):
    """Pick the number of row tiles.

    Prefer 2 "parallel" blocks (dual-TC chips get one each; 2 grid steps of ~0.35 us
    overhead are negligible); only grow the block count if a tile would blow the VMEM
    budget.  Fall back to a single full-array block when M can't be split into
    8-row-aligned halves (always a legal BlockSpec, no tail masking needed).
    """
    if M < 16 or M % 16 != 0:
        return 1

    def tile_bytes(nb):
        tm = M // nb
        return (2 * tm * K * in_bytes                      # double-buffered activation tile
                + 2 * (K * E_pad * in_bytes + E_pad * 4)   # resident weight + bias
                + 2 * tm * E_pad * out_bytes)              # double-buffered output tile

    nblk = 2
    while (tile_bytes(nblk) > vmem_budget_bytes
           and M % (2 * nblk) == 0
           and (M // (2 * nblk)) % 8 == 0):
        nblk *= 2
    return nblk


def patch_embed_proj(patches, weight, bias, *, out_dtype=jnp.float32):
    """patches: (M, K), weight: (K, E_pad), bias: (1, E_pad) -> (M, E_pad)."""
    M, K = patches.shape
    _, E_pad = weight.shape
    nblk = _num_row_blocks(M, K, E_pad,
                           in_bytes=patches.dtype.itemsize,
                           out_bytes=jnp.dtype(out_dtype).itemsize)
    tm = M // nblk
    return pl.pallas_call(
        _proj_kernel,
        out_shape=jax.ShapeDtypeStruct((M, E_pad), out_dtype),
        grid_spec=pltpu.PrefetchScalarGridSpec(
            num_scalar_prefetch=0,
            grid=(nblk,),
            in_specs=[
                pl.BlockSpec((tm, K), lambda i: (i, 0)),       # activation row tile
                pl.BlockSpec((K, E_pad), lambda i: (0, 0)),    # resident weight
                pl.BlockSpec((1, E_pad), lambda i: (0, 0)),    # resident bias (f32)
            ],
            out_specs=pl.BlockSpec((tm, E_pad), lambda i: (i, 0)),
        ),
        compiler_params=pltpu.CompilerParams(
            dimension_semantics=("parallel",),
            # Let XLA fuse the patch-extraction transpose/reshape (+ bf16 cast) into
            # this call's input DMA instead of materializing `patches` in HBM.
            allow_input_fusion=[True, False, False],
            vmem_limit_bytes=32 * 1024 * 1024,
        ),
    )(patches, weight, bias)


@functools.partial(jax.jit,
                   static_argnames=("patch_size", "embed_dim", "compute_dtype"))
def patch_embed_forward(x, proj_w, proj_b, *, patch_size, embed_dim, compute_dtype):
    """x: (B, C, D, H, W) -> (B, num_patches, embed_dim)."""
    B, C, D, H, W = x.shape
    p = patch_size
    nD, nH, nW = D // p, H // p, W // p

    # Patch extraction: pure index shuffling, patch features ordered (c, kd, kh, kw)
    # to match the PyTorch Conv3d weight layout.  Fused into the kernel's input DMA
    # via allow_input_fusion when possible.
    xp = x.reshape(B, C, nD, p, nH, p, nW, p)
    xp = jnp.transpose(xp, (0, 2, 4, 6, 1, 3, 5, 7))
    patches = xp.reshape(B * nD * nH * nW, C * p * p * p).astype(compute_dtype)

    out = patch_embed_proj(patches, proj_w, proj_b, out_dtype=x.dtype)
    # Drop the lane padding, restore (B, N, E) -- same as proj(x).flatten(2).transpose(1, 2).
    return out[:, :embed_dim].reshape(B, nD * nH * nW, embed_dim)


class PatchEmbed:
    """JAX/Pallas equivalent of the PyTorch PatchEmbed module (norm_layer=None)."""

    def __init__(self, img_size=16, patch_size=2, in_chans=4, embed_dim=48,
                 key=None, compute_dtype=jnp.bfloat16):
        self.img_size = (img_size,) * 3
        self.patch_size = (patch_size,) * 3
        self.patches_resolution = [img_size // patch_size] * 3
        self.num_patches = (img_size // patch_size) ** 3
        self.in_chans = in_chans
        self.embed_dim = embed_dim
        self.compute_dtype = compute_dtype

        if key is None:
            key = jax.random.PRNGKey(42)
        kw, kb = jax.random.split(key)
        p = patch_size
        fan_in = in_chans * p * p * p
        bound = 1.0 / (fan_in ** 0.5)
        # Conv3d weight: (embed_dim, in_chans, p, p, p); bias: (embed_dim,)  -- like PyTorch init.
        self.conv_weight = jax.random.uniform(
            kw, (embed_dim, in_chans, p, p, p), jnp.float32, -bound, bound)
        self.conv_bias = jax.random.uniform(
            kb, (embed_dim,), jnp.float32, -bound, bound)

        # Projection matrix (fan_in, embed_dim) with (c, kd, kh, kw) feature order,
        # zero-padded to a multiple of 128 output lanes (lane-dense kernel stores)
        # and cast once to the MXU compute dtype.  Bias stays f32.
        E_pad = _round_up(embed_dim, 128)
        w2d = self.conv_weight.reshape(embed_dim, fan_in).T.astype(compute_dtype)
        self.proj_w = jnp.zeros((fan_in, E_pad), compute_dtype).at[:, :embed_dim].set(w2d)
        self.proj_b = jnp.zeros((1, E_pad), jnp.float32).at[:, :embed_dim].set(self.conv_bias)

    def __call__(self, x):
        B, C, D, H, W = x.shape
        assert (D, H, W) == self.img_size, (
            f"Input image size ({D}*{H}*{W}) doesn't match model "
            f"({self.img_size[0]}*{self.img_size[1]}*{self.img_size[2]}).")
        # TODO(synk): norm_layer is None in this config; add a LayerNorm kernel if needed.
        return patch_embed_forward(
            x, self.proj_w, self.proj_b,
            patch_size=self.patch_size[0], embed_dim=self.embed_dim,
            compute_dtype=self.compute_dtype)


if __name__ == "__main__":
    key = jax.random.PRNGKey(0)
    k_x, k_params = jax.random.split(key)

    B, C, S = 2, 4, 16      # batch, in_chans, cubic spatial size
    patch, embed_dim = 2, 48

    x = jax.random.normal(k_x, (B, C, S, S, S), dtype=jnp.float32)

    model = PatchEmbed(img_size=S, patch_size=patch, in_chans=C,
                       embed_dim=embed_dim, key=k_params)
    y = jax.block_until_ready(model(x))

    expected_shape = (B, (S // patch) ** 3, embed_dim)
    assert y.shape == expected_shape, (y.shape, expected_shape)

    # Plain-JAX patch extraction (same as the wrapper's glue).
    xp = x.reshape(B, C, S // patch, patch, S // patch, patch, S // patch, patch)
    xp = jnp.transpose(xp, (0, 2, 4, 6, 1, 3, 5, 7)).reshape(-1, C * patch ** 3)
    w_f = model.conv_weight.reshape(embed_dim, -1).T      # (fan_in, embed_dim), f32

    # Reference 1: same bf16-quantized matmul in plain JAX (validates the kernel exactly).
    ref_q = (xp.astype(jnp.bfloat16).astype(jnp.float32)
             @ w_f.astype(jnp.bfloat16).astype(jnp.float32)
             + model.conv_bias[None, :]).reshape(expected_shape)
    assert jnp.allclose(y, ref_q, atol=1e-4, rtol=1e-4), \
        float(jnp.max(jnp.abs(y - ref_q)))

    # Reference 2: full-precision Conv3d-equivalent (semantic check, bf16 tolerance).
    ref_f32 = (xp @ w_f + model.conv_bias[None, :]).reshape(expected_shape)
    assert jnp.allclose(y, ref_f32, atol=2e-2, rtol=2e-2), \
        float(jnp.max(jnp.abs(y - ref_f32)))

    print("KERNEL_OK")
</pallas_src>

<mosaic_0001>
module attributes {stable_mosaic.version = 11 : i64} {
  func.func @_proj_kernel(%arg0: i32, %arg1: memref<512x32xbf16, #tpu.memory_space<vmem>>, %arg2: memref<32x128xbf16, #tpu.memory_space<vmem>>, %arg3: memref<1x128xf32, #tpu.memory_space<vmem>>, %arg4: memref<512x128xf32, #tpu.memory_space<vmem>>) attributes {dimension_semantics = [#tpu.dimension_semantics<parallel>], iteration_bounds = array<i64: 2>, scalar_prefetch = 0 : i64, scratch_operands = 0 : i64, tpu.core_type = #tpu.core_type<tc>, window_params = [{transform_indices = @transform_0, window_bounds = array<i64: 512, 32>}, {pipeline_mode = #tpu.pipeline_mode<synchronous>, transform_indices = @transform_1, window_bounds = array<i64: 32, 128>}, {pipeline_mode = #tpu.pipeline_mode<synchronous>, transform_indices = @transform_2, window_bounds = array<i64: 1, 128>}, {transform_indices = @transform_3, window_bounds = array<i64: 512, 128>}]} {
    %c0 = arith.constant 0 : index
    %c0_0 = arith.constant 0 : index
    %0 = vector.load %arg1[%c0, %c0_0] : memref<512x32xbf16, #tpu.memory_space<vmem>>, vector<512x32xbf16>
    %c0_1 = arith.constant 0 : index
    %c0_2 = arith.constant 0 : index
    %1 = vector.load %arg2[%c0_1, %c0_2] : memref<32x128xbf16, #tpu.memory_space<vmem>>, vector<32x128xbf16>
    %cst = arith.constant dense<0.000000e+00> : vector<512x128xf32>
    %2 = tpu.matmul %0, %1, %cst {dimension_numbers = #tpu.dot_dimension_numbers<[1], [0], [0], [1], [0, 0, 1, 1], [], []>} : vector<512x32xbf16>, vector<32x128xbf16>, vector<512x128xf32> -> vector<512x128xf32>
    %c0_3 = arith.constant 0 : index
    %c0_4 = arith.constant 0 : index
    %3 = vector.load %arg3[%c0_3, %c0_4] : memref<1x128xf32, #tpu.memory_space<vmem>>, vector<1x128xf32>
    %4 = vector.broadcast %3 : vector<1x128xf32> to vector<512x128xf32>
    %5 = arith.addf %2, %4 : vector<512x128xf32>
    %c0_5 = arith.constant 0 : index
    %c0_6 = arith.constant 0 : index
    %6 = vector.load %arg4[%c0_5, %c0_6] : memref<512x128xf32, #tpu.memory_space<vmem>>, vector<512x128xf32>
    tpu.vector_store %arg4[%c0_5, %c0_6], %5 {strides = array<i32>} : memref<512x128xf32, #tpu.memory_space<vmem>>, vector<512x128xf32>,
    return
  }
  func.func @transform_0(%arg0: i32) -> (i32, i32) {
    %c0_i32 = arith.constant 0 : i32
    %c0_i32_0 = arith.constant 0 : i32
    return %arg0, %c0_i32 : i32, i32
  }
  func.func @transform_1(%arg0: i32) -> (i32, i32) {
    %c0_i32 = arith.constant 0 : i32
    %c0_i32_0 = arith.constant 0 : i32
    %c0_i32_1 = arith.constant 0 : i32
    return %c0_i32, %c0_i32_0 : i32, i32
  }
  func.func @transform_2(%arg0: i32) -> (i32, i32) {
    %c0_i32 = arith.constant 0 : i32
    %c0_i32_0 = arith.constant 0 : i32
    %c0_i32_1 = arith.constant 0 : i32
    return %c0_i32, %c0_i32_0 : i32, i32
  }
  func.func @transform_3(%arg0: i32) -> (i32, i32) {
    %c0_i32 = arith.constant 0 : i32
    %c0_i32_0 = arith.constant 0 : i32
    return %arg0, %c0_i32 : i32, i32
  }
}

</mosaic_0001>

<bundles_post_ra>
// kernel: patch_embed_forward.1
= control target key start
LH: loop header
LB: loop body
LE: loop exit
PB: predicated region body
PF: predicated region fallthrough
CT: control target
= control target key end

     0   :  { %s1182_s12 = smov 0   ;;  %s1410_s0 = inlined_call_operand.vmem [shape: bf16[1024,32], index: 0, kind: input, shape index: {}]   ;;  %s1411_s1 = inlined_call_operand.vmem [shape: bf16[32,128], index: 1, kind: input, shape index: {}]   ;;  %s1412_s2 = inlined_call_operand.vmem [shape: f32[1,128], index: 2, kind: input, shape index: {}]   ;;  %s1413_s3 = inlined_call_operand.vmem [shape: f32[1024,128], index: 3, kind: output, shape index: {}]  }
   0x1 LB: > { %s928_s13 = sadd.s32 4294967295, %s1160_s12   ;;  %p932_p0 = scmp.ge.s32.totalorder %s1160_s12, 1  ;;  %s1160_s12 = sphi %s1182_s12, %s13_s12  }
   0x2   : > { %p138_p1 = scmp.lt.s32.totalorder %s1160_s12, 3 }
   0x4   : > { %p139_p2 = pnand %p932_p0, %p138_p1 }
   0x5   : > { %v1120_v0 = vld [vmem:[%s1411_s1] sm:$0xff] (!%p139_p2)   ;;  %s933_s16 = sshll.u32 (!%p139_p2), %s928_s13, 6  ;;  %v1121_v1 = vld [vmem:[%s1411_s1 + $0x8] sm:$0xff] (!%p139_p2)   ;;  %vm422_vm0 = vcmask (!%p139_p2), 261120  }
   0x6   : > { %142 = sbr.rel (%p139_p2) target bundleno = 293 (0x125), region = 32  ;;  %p163_p3 = scmp.lt.s32.totalorder (!%p139_p2), %s933_s16, 127  ;;  %1040 = vmatprep.subr.bf16.mxu0 (!%p139_p2), %v1120_v0  ;;  %1108 = vmatprep.subr.bf16.mxu1 (!%p139_p2), %v1120_v0  ;;  %v1272_v34 = vld [vmem:[%s1412_s2] ss:$0 sm:$0xff] (!%p139_p2) }
   0x7   : > { %1041 = vmatpush3.bf16.msra.mxu0 (!%p139_p2), %v1120_v0  ;;  %1110 = vmatpush3.bf16.msra.mxu1 (!%p139_p2), %v1120_v0 }
   0x8   : > { %1042 = vmatprep.subr.bf16.mxu0 (!%p139_p2), %v1121_v1  ;;  %1109 = vmatprep.subr.bf16.mxu1 (!%p139_p2), %v1121_v1 }
   0xb   : > { %1043 = vmatpush3.bf16.msra.mxu0 (!%p139_p2), %v1121_v1  ;;  %1111 = vmatpush3.bf16.msra.mxu1 (!%p139_p2), %v1121_v1 }
   0xd   : > { %s1415_s16 = smov (!%p163_p3, %s933_s16), 127 }
   0xe   : > { %s934_s19 = sshll.u32 %s1415_s16, 2  ;;  %s936_s23 = sshll.u32 %s1415_s16, 3 }
   0xf   : > { %s1202_s22 = scalar_lea.vmem %s1410_s0, %s934_s19  ;;  %s1277_s28 = scalar_lea.vmem %s1413_s3, %s936_s23 }
  0x10   : > { %v1122_v2 = vld [vmem:[%s1202_s22] sm:$0xff]   ;;  %v1124_v4 = vld [vmem:[%s1202_s22 + $0x8] sm:$0xff]   ;;  %v1126_v6 = vld [vmem:[%s1202_s22 + $0x10] sm:$0xff]  }
  0x11   : > { %v1123_v3 = vld [vmem:[%s1202_s22 + $0x80] sm:$0xff]   ;;  %1044 = vmatprep.mubr.msk.bf16.mxu0 %vm422_vm0, %v1122_v2  ;;  %v1125_v5 = vld [vmem:[%s1202_s22 + $0x88] sm:$0xff]   ;;  %v1127_v7 = vld [vmem:[%s1202_s22 + $0x90] sm:$0xff]  }
  0x12   : > { %1076 = vmatprep.mubr.msk.bf16.mxu1 %vm422_vm0, %v1123_v3  ;;  %1045 = vmatmul.mubr.msk.bf16.vlgmr.msra.gmra.mrb[0].mxu0 %vm422_vm0, %v1124_v4  ;;  %v1128_v8 = vld [vmem:[%s1202_s22 + $0x18] sm:$0xff]   ;;  %v1130_v10 = vld [vmem:[%s1202_s22 + $0x20] sm:$0xff]   ;;  %v1132_v12 = vld [vmem:[%s1202_s22 + $0x28] sm:$0xff]  }
  0x13   : > { %1077 = vmatmul.mubr.msk.bf16.vlgmr.msra.gmra.mrb[0].mxu1 %vm422_vm0, %v1125_v5  ;;  %1048 = vmatprep.mubr.msk.bf16.mxu0 %vm422_vm0, %v1126_v6  ;;  %v1129_v9 = vld [vmem:[%s1202_s22 + $0x98] sm:$0xff]   ;;  %v1131_v11 = vld [vmem:[%s1202_s22 + $0xa0] sm:$0xff]   ;;  %v1133_v13 = vld [vmem:[%s1202_s22 + $0xa8] sm:$0xff]  }
  0x14   : > { %1080 = vmatprep.mubr.msk.bf16.mxu1 %vm422_vm0, %v1127_v7  ;;  %v1134_v14 = vld [vmem:[%s1202_s22 + $0x30] sm:$0xff]   ;;  %v1136_v16 = vld [vmem:[%s1202_s22 + $0x38] sm:$0xff]   ;;  %v1138_v18 = vld [vmem:[%s1202_s22 + $0x40] sm:$0xff]  }
  0x15   : > { %v1135_v15 = vld [vmem:[%s1202_s22 + $0xb0] sm:$0xff]   ;;  %v1137_v17 = vld [vmem:[%s1202_s22 + $0xb8] sm:$0xff]   ;;  %v1139_v19 = vld [vmem:[%s1202_s22 + $0xc0] sm:$0xff]  }
  0x16   : > { %v1140_v20 = vld [vmem:[%s1202_s22 + $0x48] sm:$0xff]   ;;  %v1142_v22 = vld [vmem:[%s1202_s22 + $0x50] sm:$0xff]   ;;  %v1144_v24 = vld [vmem:[%s1202_s22 + $0x58] sm:$0xff]  }
  0x17   : > { %v1141_v21 = vld [vmem:[%s1202_s22 + $0xc8] sm:$0xff]   ;;  %v1143_v23 = vld [vmem:[%s1202_s22 + $0xd0] sm:$0xff]   ;;  %v1145_v25 = vld [vmem:[%s1202_s22 + $0xd8] sm:$0xff]  }
  0x18   : > { %v1146_v26 = vld [vmem:[%s1202_s22 + $0x60] sm:$0xff]   ;;  %v1148_v28 = vld [vmem:[%s1202_s22 + $0x68] sm:$0xff]   ;;  %v1150_v30 = vld [vmem:[%s1202_s22 + $0x70] sm:$0xff]  }
  0x19   : > { %v1147_v27 = vld [vmem:[%s1202_s22 + $0xe0] sm:$0xff]   ;;  %v1149_v29 = vld [vmem:[%s1202_s22 + $0xe8] sm:$0xff]   ;;  %v1151_v31 = vld [vmem:[%s1202_s22 + $0xf0] sm:$0xff]  }
  0x1a   : > { %1049 = vmatmul.mubr.msk.bf16.gmra.mrb[4].mxu0 %vm422_vm0, %v1128_v8  ;;  %v1152_v32 = vld [vmem:[%s1202_s22 + $0x78] sm:$0xff]  }
  0x1b   : > { %1081 = vmatmul.mubr.msk.bf16.gmra.mrb[4].mxu1 %vm422_vm0, %v1129_v9  ;;  %1052 = vmatprep.mubr.msk.bf16.mxu0 %vm422_vm0, %v1130_v10  ;;  %v1153_v33 = vld [vmem:[%s1202_s22 + $0xf8] sm:$0xff]  }
  0x1c   : > { %1084 = vmatprep.mubr.msk.bf16.mxu1 %vm422_vm0, %v1131_v11 }
  0x22   : > { %1053 = vmatmul.mubr.msk.bf16.gmra.mrb[8].mxu0 %vm422_vm0, %v1132_v12 }
  0x23   : > { %1085 = vmatmul.mubr.msk.bf16.gmra.mrb[8].mxu1 %vm422_vm0, %v1133_v13  ;;  %1056 = vmatprep.mubr.msk.bf16.mxu0 %vm422_vm0, %v1134_v14 }
  0x24   : > { %1088 = vmatprep.mubr.msk.bf16.mxu1 %vm422_vm0, %v1135_v15 }
  0x2a   : > { %1057 = vmatmul.mubr.msk.bf16.gmra.mrb[12].mxu0 %vm422_vm0, %v1136_v16 }
  0x2b   : > { %1089 = vmatmul.mubr.msk.bf16.gmra.mrb[12].mxu1 %vm422_vm0, %v1137_v17  ;;  %1060 = vmatprep.mubr.msk.bf16.mxu0 %vm422_vm0, %v1138_v18 }
  0x2c   : > { %1092 = vmatprep.mubr.msk.bf16.mxu1 %vm422_vm0, %v1139_v19 }
  0x32   : > { %1061 = vmatmul.mubr.msk.bf16.gmra.mrb[16].mxu0 %vm422_vm0, %v1140_v20 }
  0x33   : > { %1093 = vmatmul.mubr.msk.bf16.gmra.mrb[16].mxu1 %vm422_vm0, %v1141_v21  ;;  %1064 = vmatprep.mubr.msk.bf16.mxu0 %vm422_vm0, %v1142_v22 }
  0x34   : > { %1096 = vmatprep.mubr.msk.bf16.mxu1 %vm422_vm0, %v1143_v23 }
  0x3a   : > { %1065 = vmatmul.mubr.msk.bf16.gmra.mrb[20].mxu0 %vm422_vm0, %v1144_v24 }
  0x3b   : > { %1097 = vmatmul.mubr.msk.bf16.gmra.mrb[20].mxu1 %vm422_vm0, %v1145_v25  ;;  %1068 = vmatprep.mubr.msk.bf16.mxu0 %vm422_vm0, %v1146_v26 }
  0x3c   : > { %1100 = vmatprep.mubr.msk.bf16.mxu1 %vm422_vm0, %v1147_v27 }
  0x42   : > { %1069 = vmatmul.mubr.msk.bf16.gmra.mrb[24].mxu0 %vm422_vm0, %v1148_v28 }
  0x43   : > { %1101 = vmatmul.mubr.msk.bf16.gmra.mrb[24].mxu1 %vm422_vm0, %v1149_v29  ;;  %1072 = vmatprep.mubr.msk.bf16.mxu0 %vm422_vm0, %v1150_v30 }
  0x44   : > { %1104 = vmatprep.mubr.msk.bf16.mxu1 %vm422_vm0, %v1151_v31 }
  0x4a   : > { %1073 = vmatmul.mubr.msk.bf16.gmra.mrb[28].mxu0 %vm422_vm0, %v1152_v32 }
  0x4b   : > { %1105 = vmatmul.mubr.msk.bf16.gmra.mrb[28].mxu1 %vm422_vm0, %v1153_v33 }
  0xe5   : > { %v1046_v35 = vpop.f32.mrb[0].mxu0 }
  0xe6   : > { %v562_v36 = vadd.f32 %v1046_v35, %v1272_v34  ;;  %v1078_v37 = vpop.f32.mrb[0].mxu1  ;;  %v553_v38 = vpop.f32.mrb[1].mxu0 }
  0xe7   : > { %v690_v39 = vadd.f32 %v1078_v37, %v1272_v34  ;;  %v554_v40 = vadd.f32 %v1272_v34, %v553_v38  ;;  %v681_v41 = vpop.f32.mrb[1].mxu1  ;;  %v1047_v42 = vpop.f32.mrb[2].mxu0 }
  0xe8   : > { %810 = vst [vmem:[%s1277_s28 + $0x10] sm:$0xff] %v562_v36  ;;  %v682_v43 = vadd.f32 %v1272_v34, %v681_v41  ;;  %v565_v44 = vadd.f32 %v1047_v42, %v1272_v34  ;;  %v1079_v45 = vpop.f32.mrb[2].mxu1  ;;  %v556_v46 = vpop.f32.mrb[3].mxu0 }
  0xe9   : > { %842 = vst [vmem:[%s1277_s28 + $0x110] sm:$0xff] %v690_v39  ;;  %808 = vst [vmem:[%s1277_s28] sm:$0xff] %v554_v40  ;;  %v693_v47 = vadd.f32 %v1079_v45, %v1272_v34  ;;  %v557_v48 = vadd.f32 %v1272_v34, %v556_v46  ;;  %v684_v49 = vpop.f32.mrb[3].mxu1 }
  0xea   : > { %840 = vst [vmem:[%s1277_s28 + $0x100] sm:$0xff] %v682_v43  ;;  %811 = vst [vmem:[%s1277_s28 + $0x18] sm:$0xff] %v565_v44  ;;  %v685_v50 = vadd.f32 %v1272_v34, %v684_v49 }
  0xeb   : > { %843 = vst [vmem:[%s1277_s28 + $0x118] sm:$0xff] %v693_v47  ;;  %809 = vst [vmem:[%s1277_s28 + $0x8] sm:$0xff] %v557_v48 }
  0xec   : > { %841 = vst [vmem:[%s1277_s28 + $0x108] sm:$0xff] %v685_v50 }
  0xed   : > { %v1050_v51 = vpop.f32.mrb[4].mxu0 }
  0xee   : > { %v578_v52 = vadd.f32 %v1050_v51, %v1272_v34  ;;  %v1082_v53 = vpop.f32.mrb[4].mxu1  ;;  %v569_v54 = vpop.f32.mrb[5].mxu0 }
  0xef   : > { %v706_v55 = vadd.f32 %v1082_v53, %v1272_v34  ;;  %v570_v56 = vadd.f32 %v1272_v34, %v569_v54  ;;  %v697_v57 = vpop.f32.mrb[5].mxu1  ;;  %v1051_v58 = vpop.f32.mrb[6].mxu0 }
  0xf0   : > { %814 = vst [vmem:[%s1277_s28 + $0x30] sm:$0xff] %v578_v52  ;;  %v698_v59 = vadd.f32 %v1272_v34, %v697_v57  ;;  %v581_v60 = vadd.f32 %v1051_v58, %v1272_v34  ;;  %v1083_v61 = vpop.f32.mrb[6].mxu1  ;;  %v572_v62 = vpop.f32.mrb[7].mxu0 }
  0xf1   : > { %846 = vst [vmem:[%s1277_s28 + $0x130] sm:$0xff] %v706_v55  ;;  %812 = vst [vmem:[%s1277_s28 + $0x20] sm:$0xff] %v570_v56  ;;  %v709_v63 = vadd.f32 %v1083_v61, %v1272_v34  ;;  %v573_v0 = vadd.f32 %v1272_v34, %v572_v62  ;;  %v700_v1 = vpop.f32.mrb[7].mxu1 }
  0xf2   : > { %844 = vst [vmem:[%s1277_s28 + $0x120] sm:$0xff] %v698_v59  ;;  %815 = vst [vmem:[%s1277_s28 + $0x38] sm:$0xff] %v581_v60  ;;  %v701_v2 = vadd.f32 %v1272_v34, %v700_v1 }
  0xf3   : > { %847 = vst [vmem:[%s1277_s28 + $0x138] sm:$0xff] %v709_v63  ;;  %813 = vst [vmem:[%s1277_s28 + $0x28] sm:$0xff] %v573_v0 }
  0xf4   : > { %845 = vst [vmem:[%s1277_s28 + $0x128] sm:$0xff] %v701_v2 }
  0xf5   : > { %v1054_v3 = vpop.f32.mrb[8].mxu0 }
  0xf6   : > { %v594_v4 = vadd.f32 %v1054_v3, %v1272_v34  ;;  %v1086_v5 = vpop.f32.mrb[8].mxu1  ;;  %v585_v6 = vpop.f32.mrb[9].mxu0 }
  0xf7   : > { %v722_v7 = vadd.f32 %v1086_v5, %v1272_v34  ;;  %v586_v8 = vadd.f32 %v1272_v34, %v585_v6  ;;  %v713_v9 = vpop.f32.mrb[9].mxu1  ;;  %v1055_v10 = vpop.f32.mrb[10].mxu0 }
  0xf8   : > { %818 = vst [vmem:[%s1277_s28 + $0x50] sm:$0xff] %v594_v4  ;;  %v714_v11 = vadd.f32 %v1272_v34, %v713_v9  ;;  %v597_v12 = vadd.f32 %v1055_v10, %v1272_v34  ;;  %v1087_v13 = vpop.f32.mrb[10].mxu1  ;;  %v588_v14 = vpop.f32.mrb[11].mxu0 }
  0xf9   : > { %850 = vst [vmem:[%s1277_s28 + $0x150] sm:$0xff] %v722_v7  ;;  %816 = vst [vmem:[%s1277_s28 + $0x40] sm:$0xff] %v586_v8  ;;  %v725_v15 = vadd.f32 %v1087_v13, %v1272_v34  ;;  %v589_v16 = vadd.f32 %v1272_v34, %v588_v14  ;;  %v716_v17 = vpop.f32.mrb[11].mxu1 }
  0xfa   : > { %848 = vst [vmem:[%s1277_s28 + $0x140] sm:$0xff] %v714_v11  ;;  %819 = vst [vmem:[%s1277_s28 + $0x58] sm:$0xff] %v597_v12  ;;  %v717_v18 = vadd.f32 %v1272_v34, %v716_v17 }
  0xfb   : > { %851 = vst [vmem:[%s1277_s28 + $0x158] sm:$0xff] %v725_v15  ;;  %817 = vst [vmem:[%s1277_s28 + $0x48] sm:$0xff] %v589_v16 }
  0xfc   : > { %849 = vst [vmem:[%s1277_s28 + $0x148] sm:$0xff] %v717_v18 }
  0xfd   : > { %v1058_v19 = vpop.f32.mrb[12].mxu0 }
  0xfe   : > { %v610_v20 = vadd.f32 %v1058_v19, %v1272_v34  ;;  %v1090_v21 = vpop.f32.mrb[12].mxu1  ;;  %v601_v22 = vpop.f32.mrb[13].mxu0 }
  0xff   : > { %v738_v23 = vadd.f32 %v1090_v21, %v1272_v34  ;;  %v602_v24 = vadd.f32 %v1272_v34, %v601_v22  ;;  %v729_v25 = vpop.f32.mrb[13].mxu1  ;;  %v1059_v26 = vpop.f32.mrb[14].mxu0 }
 0x100   : > { %822 = vst [vmem:[%s1277_s28 + $0x70] sm:$0xff] %v610_v20  ;;  %v730_v27 = vadd.f32 %v1272_v34, %v729_v25  ;;  %v613_v28 = vadd.f32 %v1059_v26, %v1272_v34  ;;  %v1091_v29 = vpop.f32.mrb[14].mxu1  ;;  %v604_v30 = vpop.f32.mrb[15].mxu0 }
 0x101   : > { %854 = vst [vmem:[%s1277_s28 + $0x170] sm:$0xff] %v738_v23  ;;  %820 = vst [vmem:[%s1277_s28 + $0x60] sm:$0xff] %v602_v24  ;;  %v741_v31 = vadd.f32 %v1091_v29, %v1272_v34  ;;  %v605_v32 = vadd.f32 %v1272_v34, %v604_v30  ;;  %v732_v33 = vpop.f32.mrb[15].mxu1 }
 0x102   : > { %852 = vst [vmem:[%s1277_s28 + $0x160] sm:$0xff] %v730_v27  ;;  %823 = vst [vmem:[%s1277_s28 + $0x78] sm:$0xff] %v613_v28  ;;  %v733_v35 = vadd.f32 %v1272_v34, %v732_v33 }
 0x103   : > { %855 = vst [vmem:[%s1277_s28 + $0x178] sm:$0xff] %v741_v31  ;;  %821 = vst [vmem:[%s1277_s28 + $0x68] sm:$0xff] %v605_v32 }
 0x104   : > { %853 = vst [vmem:[%s1277_s28 + $0x168] sm:$0xff] %v733_v35 }
 0x105   : > { %v1062_v36 = vpop.f32.mrb[16].mxu0 }
 0x106   : > { %v626_v37 = vadd.f32 %v1062_v36, %v1272_v34  ;;  %v1094_v38 = vpop.f32.mrb[16].mxu1  ;;  %v617_v39 = vpop.f32.mrb[17].mxu0 }
 0x107   : > { %v754_v40 = vadd.f32 %v1094_v38, %v1272_v34  ;;  %v618_v41 = vadd.f32 %v1272_v34, %v617_v39  ;;  %v745_v42 = vpop.f32.mrb[17].mxu1  ;;  %v1063_v43 = vpop.f32.mrb[18].mxu0 }
 0x108   : > { %826 = vst [vmem:[%s1277_s28 + $0x90] sm:$0xff] %v626_v37  ;;  %v746_v44 = vadd.f32 %v1272_v34, %v745_v42  ;;  %v629_v45 = vadd.f32 %v1063_v43, %v1272_v34  ;;  %v1095_v46 = vpop.f32.mrb[18].mxu1  ;;  %v620_v47 = vpop.f32.mrb[19].mxu0 }
 0x109   : > { %858 = vst [vmem:[%s1277_s28 + $0x190] sm:$0xff] %v754_v40  ;;  %824 = vst [vmem:[%s1277_s28 + $0x80] sm:$0xff] %v618_v41  ;;  %v757_v48 = vadd.f32 %v1095_v46, %v1272_v34  ;;  %v621_v49 = vadd.f32 %v1272_v34, %v620_v47  ;;  %v748_v50 = vpop.f32.mrb[19].mxu1 }
 0x10a   : > { %856 = vst [vmem:[%s1277_s28 + $0x180] sm:$0xff] %v746_v44  ;;  %827 = vst [vmem:[%s1277_s28 + $0x98] sm:$0xff] %v629_v45  ;;  %v749_v51 = vadd.f32 %v1272_v34, %v748_v50 }
 0x10b   : > { %859 = vst [vmem:[%s1277_s28 + $0x198] sm:$0xff] %v757_v48  ;;  %825 = vst [vmem:[%s1277_s28 + $0x88] sm:$0xff] %v621_v49 }
 0x10c   : > { %857 = vst [vmem:[%s1277_s28 + $0x188] sm:$0xff] %v749_v51 }
 0x10d   : > { %v1066_v52 = vpop.f32.mrb[20].mxu0 }
 0x10e   : > { %v642_v53 = vadd.f32 %v1066_v52, %v1272_v34  ;;  %v1098_v54 = vpop.f32.mrb[20].mxu1  ;;  %v633_v55 = vpop.f32.mrb[21].mxu0 }
 0x10f   : > { %v770_v56 = vadd.f32 %v1098_v54, %v1272_v34  ;;  %v634_v57 = vadd.f32 %v1272_v34, %v633_v55  ;;  %v761_v58 = vpop.f32.mrb[21].mxu1  ;;  %v1067_v59 = vpop.f32.mrb[22].mxu0 }
 0x110   : > { %830 = vst [vmem:[%s1277_s28 + $0xb0] sm:$0xff] %v642_v53  ;;  %v762_v60 = vadd.f32 %v1272_v34, %v761_v58  ;;  %v645_v61 = vadd.f32 %v1067_v59, %v1272_v34  ;;  %v1099_v62 = vpop.f32.mrb[22].mxu1  ;;  %v636_v63 = vpop.f32.mrb[23].mxu0 }
 0x111   : > { %862 = vst [vmem:[%s1277_s28 + $0x1b0] sm:$0xff] %v770_v56  ;;  %828 = vst [vmem:[%s1277_s28 + $0xa0] sm:$0xff] %v634_v57  ;;  %v773_v0 = vadd.f32 %v1099_v62, %v1272_v34  ;;  %v637_v1 = vadd.f32 %v1272_v34, %v636_v63  ;;  %v764_v2 = vpop.f32.mrb[23].mxu1 }
 0x112   : > { %860 = vst [vmem:[%s1277_s28 + $0x1a0] sm:$0xff] %v762_v60  ;;  %831 = vst [vmem:[%s1277_s28 + $0xb8] sm:$0xff] %v645_v61  ;;  %v765_v3 = vadd.f32 %v1272_v34, %v764_v2 }
 0x113   : > { %863 = vst [vmem:[%s1277_s28 + $0x1b8] sm:$0xff] %v773_v0  ;;  %829 = vst [vmem:[%s1277_s28 + $0xa8] sm:$0xff] %v637_v1 }
 0x114   : > { %861 = vst [vmem:[%s1277_s28 + $0x1a8] sm:$0xff] %v765_v3 }
 0x115   : > { %v1070_v4 = vpop.f32.mrb[24].mxu0 }
 0x116   : > { %v658_v5 = vadd.f32 %v1070_v4, %v1272_v34  ;;  %v1102_v6 = vpop.f32.mrb[24].mxu1  ;;  %v649_v7 = vpop.f32.mrb[25].mxu0 }
 0x117   : > { %v786_v8 = vadd.f32 %v1102_v6, %v1272_v34  ;;  %v650_v9 = vadd.f32 %v1272_v34, %v649_v7  ;;  %v777_v10 = vpop.f32.mrb[25].mxu1  ;;  %v1071_v11 = vpop.f32.mrb[26].mxu0 }
 0x118   : > { %834 = vst [vmem:[%s1277_s28 + $0xd0] sm:$0xff] %v658_v5  ;;  %v778_v12 = vadd.f32 %v1272_v34, %v777_v10  ;;  %v661_v13 = vadd.f32 %v1071_v11, %v1272_v34  ;;  %v1103_v14 = vpop.f32.mrb[26].mxu1  ;;  %v652_v15 = vpop.f32.mrb[27].mxu0 }
 0x119   : > { %866 = vst [vmem:[%s1277_s28 + $0x1d0] sm:$0xff] %v786_v8  ;;  %832 = vst [vmem:[%s1277_s28 + $0xc0] sm:$0xff] %v650_v9  ;;  %v789_v16 = vadd.f32 %v1103_v14, %v1272_v34  ;;  %v653_v17 = vadd.f32 %v1272_v34, %v652_v15  ;;  %v780_v18 = vpop.f32.mrb[27].mxu1 }
 0x11a   : > { %864 = vst [vmem:[%s1277_s28 + $0x1c0] sm:$0xff] %v778_v12  ;;  %835 = vst [vmem:[%s1277_s28 + $0xd8] sm:$0xff] %v661_v13  ;;  %v781_v19 = vadd.f32 %v1272_v34, %v780_v18 }
 0x11b   : > { %867 = vst [vmem:[%s1277_s28 + $0x1d8] sm:$0xff] %v789_v16  ;;  %833 = vst [vmem:[%s1277_s28 + $0xc8] sm:$0xff] %v653_v17 }
 0x11c   : > { %865 = vst [vmem:[%s1277_s28 + $0x1c8] sm:$0xff] %v781_v19 }
 0x11d   : > { %v1074_v20 = vpop.f32.mrb[28].mxu0 }
 0x11e   : > { %v674_v21 = vadd.f32 %v1074_v20, %v1272_v34  ;;  %v1106_v22 = vpop.f32.mrb[28].mxu1  ;;  %v665_v23 = vpop.f32.mrb[29].mxu0 }
 0x11f   : > { %v802_v24 = vadd.f32 %v1106_v22, %v1272_v34  ;;  %v666_v25 = vadd.f32 %v1272_v34, %v665_v23  ;;  %v793_v26 = vpop.f32.mrb[29].mxu1  ;;  %v1075_v27 = vpop.f32.mrb[30].mxu0 }
 0x120   : > { %838 = vst [vmem:[%s1277_s28 + $0xf0] sm:$0xff] %v674_v21  ;;  %v794_v28 = vadd.f32 %v1272_v34, %v793_v26  ;;  %v677_v29 = vadd.f32 %v1075_v27, %v1272_v34  ;;  %v1107_v30 = vpop.f32.mrb[30].mxu1  ;;  %v668_v31 = vpop.f32.mrb[31].mxu0 }
 0x121   : > { %870 = vst [vmem:[%s1277_s28 + $0x1f0] sm:$0xff] %v802_v24  ;;  %836 = vst [vmem:[%s1277_s28 + $0xe0] sm:$0xff] %v666_v25  ;;  %v805_v32 = vadd.f32 %v1107_v30, %v1272_v34  ;;  %v669_v33 = vadd.f32 %v1272_v34, %v668_v31  ;;  %v796_v35 = vpop.f32.mrb[31].mxu1 }
 0x122   : > { %868 = vst [vmem:[%s1277_s28 + $0x1e0] sm:$0xff] %v794_v28  ;;  %839 = vst [vmem:[%s1277_s28 + $0xf8] sm:$0xff] %v677_v29  ;;  %v797_v36 = vadd.f32 %v1272_v34, %v796_v35 }
 0x123   : > { %871 = vst [vmem:[%s1277_s28 + $0x1f8] sm:$0xff] %v805_v32  ;;  %837 = vst [vmem:[%s1277_s28 + $0xe8] sm:$0xff] %v669_v33 }
 0x124   : > { %869 = vst [vmem:[%s1277_s28 + $0x1e8] sm:$0xff] %v797_v36 }
 0x125 PF: > { %s13_s12 = sadd.s32 1, %s1160_s12  }
 0x126   : > { %p10_p4 = scmp.ge.s32.totalorder %s13_s12, 4  }
 0x128   :  { %12 = sbr.rel (!%p10_p4) target bundleno = 1 (0x1), region = 62 }

</bundles_post_ra>
